<compile_context>
chip_gen: v5e
topology: v5e:2x2
jax: 0.10.0
libtpu: 0.0.40
codegen_flags: <defaults>
</compile_context>

<pallas_src>
import functools
import math

import jax
import jax.numpy as jnp
from jax.experimental import pallas as pl
from jax.experimental.pallas import tpu as pltpu


# ----------------------------- small helpers ---------------------------------

def _round_up(v, m):
    return ((v + m - 1) // m) * m


def _pad2(x, rows, cols):
    return jnp.pad(x, ((0, rows - x.shape[0]), (0, cols - x.shape[1])))


def _pad_bias(b, to):
    return jnp.pad(b, (0, to - b.shape[0])).reshape(1, -1).astype(jnp.float32)


@functools.lru_cache(maxsize=1)
def _vmem_config():
    """(fused_path_budget_bytes, mosaic_vmem_limit_bytes), generation-aware."""
    cap = 64 * 1024 * 1024
    try:
        cap = int(getattr(pltpu.get_tpu_info(), "vmem_capacity_bytes", cap))
    except Exception:
        pass
    if cap >= 96 * 1024 * 1024:
        # v5e / v6e: 128 MiB VMEM per core — keep A resident as long as possible.
        return 88 * 1024 * 1024, 100 * 1024 * 1024
    # v7x: 64 MiB VMEM, 2 TCs per chip — tighter budget, prefer the
    # row-parallel tiled path for medium graphs.
    return 30 * 1024 * 1024, 40 * 1024 * 1024


def _fused_vmem_bytes(n_pad, f_pad, h_pad):
    """Generous upper bound on live VMEM for the fully fused kernel
    (counts f32 temporaries + bf16 casts the kernel body materializes)."""
    m = max(f_pad, h_pad)
    return (2 * n_pad * n_pad                                    # bf16 A_hat
            + 2 * n_pad * f_pad                                  # bf16 X
            + 2 * (f_pad * h_pad + 2 * h_pad * h_pad + h_pad * f_pad)  # weights
            + 4 * n_pad * (h_pad + f_pad)                        # f32 outputs
            + 10 * 4 * n_pad * m)                                # temporaries


def _pick_tile(n_pad):
    """Largest tile in {512, 256, 128} dividing n_pad (n_pad is a mult of 128)."""
    for t in (512, 256, 128):
        if n_pad % t == 0:
            return t
    return 128


# ----------------------------- Pallas kernels --------------------------------

def _fused_gae_kernel(a_ref, x_ref, w1_ref, b1_ref, w2_ref, b2_ref,
                      w3_ref, b3_ref, w4_ref, b4_ref,
                      emb_ref, xr_ref):
    """All four GCN layers fused; A_hat and weights stay VMEM-resident.

    a_ref : [Np, Np] bf16 normalized adjacency
    x_ref : [Np, Fp] bf16 node features
    w*    : bf16 weights, b* : f32 biases [1, Fout]
    emb_ref : [Np, Hp] f32 (encoder output emb_c)
    xr_ref  : [Np, Fp] f32 (decoder reconstruction x_)
    """
    a = a_ref[...]  # bf16, resident for all 4 layers

    def gcn(h_bf16, w_ref, b_ref, relu):
        # h @ W  (MXU, f32 accumulate)
        xw = jnp.dot(h_bf16, w_ref[...], preferred_element_type=jnp.float32)
        # A_hat @ (hW)
        out = jnp.dot(a, xw.astype(jnp.bfloat16),
                      preferred_element_type=jnp.float32)
        out = out + b_ref[...]          # f32 epilogue (v5e: no bf16 VPU)
        if relu:
            out = jnp.maximum(out, 0.0)
        return out

    # encoder: in -> hid (relu) -> hid
    h1 = gcn(x_ref[...], w1_ref, b1_ref, True)
    emb_c = gcn(h1.astype(jnp.bfloat16), w2_ref, b2_ref, False)
    emb_ref[...] = emb_c
    # decoder: hid -> hid (relu) -> in
    d = gcn(emb_c.astype(jnp.bfloat16), w3_ref, b3_ref, True)
    xr_ref[...] = gcn(d.astype(jnp.bfloat16), w4_ref, b4_ref, False)


def _gcn_layer_kernel(a_ref, h_ref, w_ref, b_ref, o_ref, acc_ref, *, apply_relu):
    """One GCN layer, (A @ h) @ W + b, K-tiled over the node contraction.

    grid = (row_tiles, k_tiles):
      a_ref : [tile_m, tile_k] bf16 (streamed)
      h_ref : [tile_k, H_in]   bf16 (streamed)
      w_ref : [H_in, H_out]    bf16 (resident, constant index_map)
      b_ref : [1, H_out]       f32  (resident)
      o_ref : [tile_m, H_out]  (written only in the last-K epilogue)
      acc_ref: [tile_m, H_in]  f32 accumulator scratch
    """
    k = pl.program_id(1)

    @pl.when(k == 0)
    def _():
        acc_ref[...] = jnp.zeros_like(acc_ref)

    acc_ref[...] += jnp.dot(a_ref[...], h_ref[...],
                            preferred_element_type=jnp.float32)

    @pl.when(k == pl.num_programs(1) - 1)
    def _():
        out = jnp.dot(acc_ref[...].astype(jnp.bfloat16), w_ref[...],
                      preferred_element_type=jnp.float32)
        out = out + b_ref[...]
        if apply_relu:
            out = jnp.maximum(out, 0.0)
        o_ref[...] = out.astype(o_ref.dtype)


# ----------------------------- Pallas wrappers --------------------------------

def _fused_forward(a_p, x_p, w1, b1, w2, b2, w3, b3, w4, b4, *, vmem_limit):
    n_pad = a_p.shape[0]
    h_pad = w1.shape[1]
    f_pad = w4.shape[1]
    vmem = pl.BlockSpec(memory_space=pltpu.MemorySpace.VMEM)
    return pl.pallas_call(
        _fused_gae_kernel,
        out_shape=(
            jax.ShapeDtypeStruct((n_pad, h_pad), jnp.float32),   # emb_c
            jax.ShapeDtypeStruct((n_pad, f_pad), jnp.float32),   # x_
        ),
        in_specs=[vmem] * 10,
        out_specs=(vmem, vmem),
        compiler_params=pltpu.CompilerParams(vmem_limit_bytes=vmem_limit),
    )(a_p, x_p, w1, b1, w2, b2, w3, b3, w4, b4)


def _tiled_gcn_layer(a_bf16, h_bf16, w_bf16, bias_f32, *, apply_relu,
                     tile_m, tile_k, out_dtype, vmem_limit):
    """One GCN layer = one pallas_call; A streamed in (tile_m, tile_k) blocks,
    VMEM bounded independent of N, rows split across TCs ("parallel")."""
    n = a_bf16.shape[0]
    h_in = h_bf16.shape[1]
    h_out = w_bf16.shape[1]
    assert n % tile_m == 0 and n % tile_k == 0
    kernel = functools.partial(_gcn_layer_kernel, apply_relu=apply_relu)
    return pl.pallas_call(
        kernel,
        out_shape=jax.ShapeDtypeStruct((n, h_out), out_dtype),
        grid_spec=pltpu.PrefetchScalarGridSpec(
            num_scalar_prefetch=0,
            grid=(n // tile_m, n // tile_k),
            in_specs=[
                pl.BlockSpec((tile_m, tile_k), lambda i, k: (i, k)),   # A stream
                pl.BlockSpec((tile_k, h_in), lambda i, k: (k, 0)),     # h stream
                pl.BlockSpec((h_in, h_out), lambda i, k: (0, 0)),      # W resident
                pl.BlockSpec((1, h_out), lambda i, k: (0, 0)),         # bias resident
            ],
            out_specs=pl.BlockSpec((tile_m, h_out), lambda i, k: (i, 0)),
            scratch_shapes=[pltpu.VMEM((tile_m, h_in), jnp.float32)],
        ),
        compiler_params=pltpu.CompilerParams(
            dimension_semantics=("parallel", "arbitrary"),
            vmem_limit_bytes=vmem_limit,
        ),
    )(a_bf16, h_bf16, w_bf16, bias_f32)


# ------------------------------ JAX glue --------------------------------------

def normalized_adjacency(edge_index, num_nodes):
    """Dense A_hat = D^{-1/2}(A + I)D^{-1/2} (GCNConv default normalization).

    Assumes edge_index has no pre-existing self-loops; duplicate edges are
    counted (scatter-add), matching PyG message passing.
    """
    src, dst = edge_index[0], edge_index[1]
    a = jnp.zeros((num_nodes, num_nodes), jnp.float32).at[src, dst].add(1.0)
    a = a + jnp.eye(num_nodes, dtype=jnp.float32)   # add self loops
    deg = jnp.sum(a, axis=1)
    d_inv_sqrt = jnp.where(deg > 0, 1.0 / jnp.sqrt(deg), 0.0)
    return a * d_inv_sqrt[:, None] * d_inv_sqrt[None, :]


def init_params(key, in_dim, hid_dim):
    """Glorot-style deterministic init for the 4 GCNConv layers (2 enc + 2 dec)."""
    def glorot(k, fan_in, fan_out):
        limit = math.sqrt(6.0 / (fan_in + fan_out))
        return jax.random.uniform(k, (fan_in, fan_out), jnp.float32, -limit, limit)

    k = jax.random.split(key, 4)
    return {
        "enc_w1": glorot(k[0], in_dim, hid_dim),
        "enc_b1": jnp.zeros((hid_dim,), jnp.float32),
        "enc_w2": glorot(k[1], hid_dim, hid_dim),
        "enc_b2": jnp.zeros((hid_dim,), jnp.float32),
        "dec_w1": glorot(k[2], hid_dim, hid_dim),
        "dec_b1": jnp.zeros((hid_dim,), jnp.float32),
        "dec_w2": glorot(k[3], hid_dim, in_dim),
        "dec_b2": jnp.zeros((in_dim,), jnp.float32),
    }


@functools.partial(jax.jit, static_argnames=("force_tiled",))
def encoderf_base_forward(params, x, edge_index, *, force_tiled=False):
    """Mirrors encoderfBase.forward (the `if self.backbone == MLP or True` branch)."""
    n, f_in = x.shape
    hid = params["enc_w1"].shape[1]

    # lane-dense padding (zero padding is mathematically exact here)
    f_pad = _round_up(f_in, 128)
    h_pad = _round_up(hid, 128)
    n_pad = _round_up(n, 128)

    fused_budget, vmem_limit = _vmem_config()
    use_fused = (not force_tiled) and (
        _fused_vmem_bytes(n_pad, f_pad, h_pad) <= fused_budget)

    a_p = _pad2(normalized_adjacency(edge_index, n), n_pad, n_pad).astype(jnp.bfloat16)
    x_p = _pad2(x, n_pad, f_pad).astype(jnp.bfloat16)

    w1 = _pad2(params["enc_w1"], f_pad, h_pad).astype(jnp.bfloat16)
    w2 = _pad2(params["enc_w2"], h_pad, h_pad).astype(jnp.bfloat16)
    w3 = _pad2(params["dec_w1"], h_pad, h_pad).astype(jnp.bfloat16)
    w4 = _pad2(params["dec_w2"], h_pad, f_pad).astype(jnp.bfloat16)
    b1 = _pad_bias(params["enc_b1"], h_pad)
    b2 = _pad_bias(params["enc_b2"], h_pad)
    b3 = _pad_bias(params["dec_b1"], h_pad)
    b4 = _pad_bias(params["dec_b2"], f_pad)

    if use_fused:
        emb_c_p, xr_p = _fused_forward(a_p, x_p, w1, b1, w2, b2, w3, b3, w4, b4,
                                       vmem_limit=vmem_limit)
        emb_c = emb_c_p[:n, :hid]
    else:
        tile = _pick_tile(n_pad)
        layer = functools.partial(_tiled_gcn_layer, a_p,
                                  tile_m=tile, tile_k=tile, vmem_limit=vmem_limit)
        # encoder: in -> hid (relu) -> hid ; intermediates stay bf16
        h1 = layer(x_p, w1, b1, apply_relu=True, out_dtype=jnp.bfloat16)
        emb_c_p = layer(h1, w2, b2, apply_relu=False, out_dtype=jnp.bfloat16)
        # decoder: hid -> hid (relu) -> in
        d = layer(emb_c_p, w3, b3, apply_relu=True, out_dtype=jnp.bfloat16)
        xr_p = layer(d, w4, b4, apply_relu=False, out_dtype=jnp.float32)
        emb_c = emb_c_p[:n, :hid].astype(jnp.float32)

    x_ = xr_p[:n, :f_in]
    # The reference calls the SAME encoder twice on identical inputs, so
    # emb_s == emb_c; build emb without recomputing the encoder.
    emb = jnp.concatenate([emb_c, emb_c], axis=1)
    out, prop = 1, 1
    return x_, out, prop, emb


# ------------------------------- driver ---------------------------------------

if __name__ == "__main__":
    N = 20        # nodes (exercises row padding)
    IN_DIM = 32   # input feature dim
    HID_DIM = 64  # hidden dim (module default)

    key = jax.random.PRNGKey(0)
    k_x, k_p = jax.random.split(key)

    # deterministic node features
    x = jax.random.normal(k_x, (N, IN_DIM), dtype=jnp.float32)

    # deterministic undirected ring graph as edge_index [2, E]
    src = jnp.arange(N, dtype=jnp.int32)
    dst = (src + 1) % N
    edge_index = jnp.concatenate(
        [jnp.stack([src, dst], axis=0), jnp.stack([dst, src], axis=0)], axis=1
    )

    params = init_params(k_p, IN_DIM, HID_DIM)

    # primary path: single fused Pallas kernel (A_hat + all layers VMEM-resident)
    x_f, out, prop, emb_f = encoderf_base_forward(params, x, edge_index)
    jax.block_until_ready((x_f, emb_f))

    # also exercise the K-tiled / row-parallel large-N path and cross-check it
    x_t, _, _, emb_t = encoderf_base_forward(params, x, edge_index, force_tiled=True)
    jax.block_until_ready((x_t, emb_t))

    assert x_f.shape == (N, IN_DIM)
    assert emb_f.shape == (N, 2 * HID_DIM)
    assert (out, prop) == (1, 1)
    assert bool(jnp.allclose(x_f, x_t, atol=5e-2, rtol=5e-2))
    assert bool(jnp.allclose(emb_f, emb_t, atol=5e-2, rtol=5e-2))

    print("KERNEL_OK")
</pallas_src>

<mosaic_0001>
module attributes {stable_mosaic.version = 11 : i64} {
  func.func @_fused_gae_kernel(%arg0: memref<128x128xbf16, #tpu.memory_space<vmem>>, %arg1: memref<128x128xbf16, #tpu.memory_space<vmem>>, %arg2: memref<128x128xbf16, #tpu.memory_space<vmem>>, %arg3: memref<1x128xf32, #tpu.memory_space<vmem>>, %arg4: memref<128x128xbf16, #tpu.memory_space<vmem>>, %arg5: memref<1x128xf32, #tpu.memory_space<vmem>>, %arg6: memref<128x128xbf16, #tpu.memory_space<vmem>>, %arg7: memref<1x128xf32, #tpu.memory_space<vmem>>, %arg8: memref<128x128xbf16, #tpu.memory_space<vmem>>, %arg9: memref<1x128xf32, #tpu.memory_space<vmem>>, %arg10: memref<128x128xf32, #tpu.memory_space<vmem>>, %arg11: memref<128x128xf32, #tpu.memory_space<vmem>>) attributes {dimension_semantics = [], scalar_prefetch = 0 : i64, scratch_operands = 0 : i64, tpu.core_type = #tpu.core_type<tc>} {
    %c0 = arith.constant 0 : index
    %c0_0 = arith.constant 0 : index
    %0 = vector.load %arg0[%c0, %c0_0] : memref<128x128xbf16, #tpu.memory_space<vmem>>, vector<128x128xbf16>
    %c0_1 = arith.constant 0 : index
    %c0_2 = arith.constant 0 : index
    %1 = vector.load %arg1[%c0_1, %c0_2] : memref<128x128xbf16, #tpu.memory_space<vmem>>, vector<128x128xbf16>
    %c0_3 = arith.constant 0 : index
    %c0_4 = arith.constant 0 : index
    %2 = vector.load %arg2[%c0_3, %c0_4] : memref<128x128xbf16, #tpu.memory_space<vmem>>, vector<128x128xbf16>
    %cst = arith.constant dense<0.000000e+00> : vector<128x128xf32>
    %3 = tpu.matmul %1, %2, %cst {dimension_numbers = #tpu.dot_dimension_numbers<[1], [0], [0], [1], [0, 0, 1, 1], [], []>} : vector<128x128xbf16>, vector<128x128xbf16>, vector<128x128xf32> -> vector<128x128xf32>
    %4 = arith.truncf %3 : vector<128x128xf32> to vector<128x128xbf16>
    %cst_5 = arith.constant dense<0.000000e+00> : vector<128x128xf32>
    %5 = tpu.matmul %0, %4, %cst_5 {dimension_numbers = #tpu.dot_dimension_numbers<[1], [0], [0], [1], [0, 0, 1, 1], [], []>} : vector<128x128xbf16>, vector<128x128xbf16>, vector<128x128xf32> -> vector<128x128xf32>
    %c0_6 = arith.constant 0 : index
    %c0_7 = arith.constant 0 : index
    %6 = vector.load %arg3[%c0_6, %c0_7] : memref<1x128xf32, #tpu.memory_space<vmem>>, vector<1x128xf32>
    %7 = vector.broadcast %6 : vector<1x128xf32> to vector<128x128xf32>
    %8 = arith.addf %5, %7 : vector<128x128xf32>
    %cst_8 = arith.constant 0.000000e+00 : f32
    %9 = vector.broadcast %cst_8 : f32 to vector<128x128xf32>
    %10 = arith.maximumf %8, %9 : vector<128x128xf32>
    %11 = arith.truncf %10 : vector<128x128xf32> to vector<128x128xbf16>
    %c0_9 = arith.constant 0 : index
    %c0_10 = arith.constant 0 : index
    %12 = vector.load %arg4[%c0_9, %c0_10] : memref<128x128xbf16, #tpu.memory_space<vmem>>, vector<128x128xbf16>
    %cst_11 = arith.constant dense<0.000000e+00> : vector<128x128xf32>
    %13 = tpu.matmul %11, %12, %cst_11 {dimension_numbers = #tpu.dot_dimension_numbers<[1], [0], [0], [1], [0, 0, 1, 1], [], []>} : vector<128x128xbf16>, vector<128x128xbf16>, vector<128x128xf32> -> vector<128x128xf32>
    %14 = arith.truncf %13 : vector<128x128xf32> to vector<128x128xbf16>
    %cst_12 = arith.constant dense<0.000000e+00> : vector<128x128xf32>
    %15 = tpu.matmul %0, %14, %cst_12 {dimension_numbers = #tpu.dot_dimension_numbers<[1], [0], [0], [1], [0, 0, 1, 1], [], []>} : vector<128x128xbf16>, vector<128x128xbf16>, vector<128x128xf32> -> vector<128x128xf32>
    %c0_13 = arith.constant 0 : index
    %c0_14 = arith.constant 0 : index
    %16 = vector.load %arg5[%c0_13, %c0_14] : memref<1x128xf32, #tpu.memory_space<vmem>>, vector<1x128xf32>
    %17 = vector.broadcast %16 : vector<1x128xf32> to vector<128x128xf32>
    %18 = arith.addf %15, %17 : vector<128x128xf32>
    %c0_15 = arith.constant 0 : index
    %c0_16 = arith.constant 0 : index
    %19 = vector.load %arg10[%c0_15, %c0_16] : memref<128x128xf32, #tpu.memory_space<vmem>>, vector<128x128xf32>
    tpu.vector_store %arg10[%c0_15, %c0_16], %18 {strides = array<i32>} : memref<128x128xf32, #tpu.memory_space<vmem>>, vector<128x128xf32>,
    %20 = arith.truncf %18 : vector<128x128xf32> to vector<128x128xbf16>
    %c0_17 = arith.constant 0 : index
    %c0_18 = arith.constant 0 : index
    %21 = vector.load %arg6[%c0_17, %c0_18] : memref<128x128xbf16, #tpu.memory_space<vmem>>, vector<128x128xbf16>
    %cst_19 = arith.constant dense<0.000000e+00> : vector<128x128xf32>
    %22 = tpu.matmul %20, %21, %cst_19 {dimension_numbers = #tpu.dot_dimension_numbers<[1], [0], [0], [1], [0, 0, 1, 1], [], []>} : vector<128x128xbf16>, vector<128x128xbf16>, vector<128x128xf32> -> vector<128x128xf32>
    %23 = arith.truncf %22 : vector<128x128xf32> to vector<128x128xbf16>
    %cst_20 = arith.constant dense<0.000000e+00> : vector<128x128xf32>
    %24 = tpu.matmul %0, %23, %cst_20 {dimension_numbers = #tpu.dot_dimension_numbers<[1], [0], [0], [1], [0, 0, 1, 1], [], []>} : vector<128x128xbf16>, vector<128x128xbf16>, vector<128x128xf32> -> vector<128x128xf32>
    %c0_21 = arith.constant 0 : index
    %c0_22 = arith.constant 0 : index
    %25 = vector.load %arg7[%c0_21, %c0_22] : memref<1x128xf32, #tpu.memory_space<vmem>>, vector<1x128xf32>
    %26 = vector.broadcast %25 : vector<1x128xf32> to vector<128x128xf32>
    %27 = arith.addf %24, %26 : vector<128x128xf32>
    %cst_23 = arith.constant 0.000000e+00 : f32
    %28 = vector.broadcast %cst_23 : f32 to vector<128x128xf32>
    %29 = arith.maximumf %27, %28 : vector<128x128xf32>
    %30 = arith.truncf %29 : vector<128x128xf32> to vector<128x128xbf16>
    %c0_24 = arith.constant 0 : index
    %c0_25 = arith.constant 0 : index
    %31 = vector.load %arg8[%c0_24, %c0_25] : memref<128x128xbf16, #tpu.memory_space<vmem>>, vector<128x128xbf16>
    %cst_26 = arith.constant dense<0.000000e+00> : vector<128x128xf32>
    %32 = tpu.matmul %30, %31, %cst_26 {dimension_numbers = #tpu.dot_dimension_numbers<[1], [0], [0], [1], [0, 0, 1, 1], [], []>} : vector<128x128xbf16>, vector<128x128xbf16>, vector<128x128xf32> -> vector<128x128xf32>
    %33 = arith.truncf %32 : vector<128x128xf32> to vector<128x128xbf16>
    %cst_27 = arith.constant dense<0.000000e+00> : vector<128x128xf32>
    %34 = tpu.matmul %0, %33, %cst_27 {dimension_numbers = #tpu.dot_dimension_numbers<[1], [0], [0], [1], [0, 0, 1, 1], [], []>} : vector<128x128xbf16>, vector<128x128xbf16>, vector<128x128xf32> -> vector<128x128xf32>
    %c0_28 = arith.constant 0 : index
    %c0_29 = arith.constant 0 : index
    %35 = vector.load %arg9[%c0_28, %c0_29] : memref<1x128xf32, #tpu.memory_space<vmem>>, vector<1x128xf32>
    %36 = vector.broadcast %35 : vector<1x128xf32> to vector<128x128xf32>
    %37 = arith.addf %34, %36 : vector<128x128xf32>
    %c0_30 = arith.constant 0 : index
    %c0_31 = arith.constant 0 : index
    %38 = vector.load %arg11[%c0_30, %c0_31] : memref<128x128xf32, #tpu.memory_space<vmem>>, vector<128x128xf32>
    tpu.vector_store %arg11[%c0_30, %c0_31], %37 {strides = array<i32>} : memref<128x128xf32, #tpu.memory_space<vmem>>, vector<128x128xf32>,
    return
  }
}

</mosaic_0001>

<bundles_post_ra>
// kernel: encoderf_base_forward.1
= control target key start
LH: loop header
LB: loop body
LE: loop exit
PB: predicated region body
PF: predicated region fallthrough
CT: control target
= control target key end

     0   :  { %s1561_s2 = inlined_call_operand.vmem [shape: bf16[128,128], index: 2, kind: input, shape index: {}]   ;;  %s1562_s1 = inlined_call_operand.vmem [shape: bf16[128,128], index: 1, kind: input, shape index: {}]   ;;  %s1563_s3 = inlined_call_operand.vmem [shape: f32[1,128], index: 3, kind: input, shape index: {}]   ;;  %s1564_s0 = inlined_call_operand.vmem [shape: bf16[128,128], index: 0, kind: input, shape index: {}]   ;;  %s1565_s4 = inlined_call_operand.vmem [shape: bf16[128,128], index: 4, kind: input, shape index: {}]   ;;  %s1566_s5 = inlined_call_operand.vmem [shape: f32[1,128], index: 5, kind: input, shape index: {}]   ;;  %s1567_s6 = inlined_call_operand.vmem [shape: bf16[128,128], index: 6, kind: input, shape index: {}]   ;;  %s1568_s10 = inlined_call_operand.vmem [shape: f32[128,128], index: 10, kind: output, shape index: {0}]   ;;  %s1569_s7 = inlined_call_operand.vmem [shape: f32[1,128], index: 7, kind: input, shape index: {}]   ;;  %s1570_s8 = inlined_call_operand.vmem [shape: bf16[128,128], index: 8, kind: input, shape index: {}]   ;;  %s1571_s9 = inlined_call_operand.vmem [shape: f32[1,128], index: 9, kind: input, shape index: {}]   ;;  %s1572_s11 = inlined_call_operand.vmem [shape: f32[128,128], index: 11, kind: output, shape index: {1}]  }
   0x1   :  { %v1172_v0 = vld [vmem:[%s1561_s2 + $0x38] sm:$0xff]  ;;  %v1171_v1 = vld [vmem:[%s1561_s2 + $0x30] sm:$0xff]  ;;  %v1170_v2 = vld [vmem:[%s1561_s2 + $0x28] sm:$0xff] }
   0x2   :  { %181 = vmatpush.bf16.msra.mxu0 %v1172_v0  ;;  %v1169_v3 = vld [vmem:[%s1561_s2 + $0x20] sm:$0xff]  ;;  %v1168_v4 = vld [vmem:[%s1561_s2 + $0x18] sm:$0xff]  ;;  %v1167_v5 = vld [vmem:[%s1561_s2 + $0x10] sm:$0xff] }
   0x3   :  { %v1166_v6 = vld [vmem:[%s1561_s2 + $0x8] sm:$0xff]  ;;  %v1165_v7 = vld [vmem:[%s1561_s2] sm:$0xff]  ;;  %v1159_v10 = vld [vmem:[%s1562_s1 + $0x10] sm:$0xff] }
   0x4   :  { %v1157_v8 = vld [vmem:[%s1562_s1] sm:$0xff]  ;;  %v1158_v9 = vld [vmem:[%s1562_s1 + $0x8] sm:$0xff]  ;;  %v1160_v11 = vld [vmem:[%s1562_s1 + $0x18] sm:$0xff] }
   0x5   :  { %v1161_v12 = vld [vmem:[%s1562_s1 + $0x20] sm:$0xff]  ;;  %v1162_v13 = vld [vmem:[%s1562_s1 + $0x28] sm:$0xff]  ;;  %v1163_v14 = vld [vmem:[%s1562_s1 + $0x30] sm:$0xff] }
   0x6   :  { %182 = vmatpush.bf16.msra.mxu0 %v1171_v1  ;;  %v1164_v15 = vld [vmem:[%s1562_s1 + $0x38] sm:$0xff]  ;;  %v1312_v40 = vld [vmem:[%s1564_s0] sm:$0xff]  ;;  %v1318_v41 = vld [vmem:[%s1564_s0 + $0x8] sm:$0xff] }
   0x7   :  { %v1324_v42 = vld [vmem:[%s1564_s0 + $0x10] sm:$0xff]  ;;  %v1330_v43 = vld [vmem:[%s1564_s0 + $0x18] sm:$0xff]  ;;  %v1336_v44 = vld [vmem:[%s1564_s0 + $0x20] sm:$0xff] }
   0x8   :  { %v1180_v45 = vld [vmem:[%s1565_s4 + $0x38] sm:$0xff]  ;;  %v1345_v46 = vld [vmem:[%s1564_s0 + $0x28] sm:$0xff]  ;;  %v1179_v47 = vld [vmem:[%s1565_s4 + $0x30] sm:$0xff] }
   0x9   :  { %427 = vmatpush.bf16.msra.mxu2 %v1180_v45  ;;  %v1178_v48 = vld [vmem:[%s1565_s4 + $0x28] sm:$0xff]  ;;  %v1177_v49 = vld [vmem:[%s1565_s4 + $0x20] sm:$0xff]  ;;  %v1176_v50 = vld [vmem:[%s1565_s4 + $0x18] sm:$0xff] }
   0xa   :  { %183 = vmatpush.bf16.msra.mxu0 %v1170_v2  ;;  %v1363_v51 = vld [vmem:[%s1564_s0 + $0x30] sm:$0xff]  ;;  %v1174_v53 = vld [vmem:[%s1565_s4 + $0x8] sm:$0xff]  ;;  %v1173_v54 = vld [vmem:[%s1565_s4] sm:$0xff] }
   0xb   :  { %v1175_v52 = vld [vmem:[%s1565_s4 + $0x10] sm:$0xff]  ;;  %v1378_v55 = vld [vmem:[%s1564_s0 + $0x38] sm:$0xff]  ;;  %v1197_v57 = vld [vmem:[%s1563_s3] ss:$0 sm:$0xff] }
   0xd   :  { %428 = vmatpush.bf16.msra.mxu2 %v1179_v47 }
   0xe   :  { %184 = vmatpush.bf16.msra.mxu0 %v1169_v3 }
  0x11   :  { %429 = vmatpush.bf16.msra.mxu2 %v1178_v48 }
  0x12   :  { %185 = vmatpush.bf16.msra.mxu0 %v1168_v4 }
  0x15   :  { %430 = vmatpush.bf16.msra.mxu2 %v1177_v49 }
  0x16   :  { %186 = vmatpush.bf16.msra.mxu0 %v1167_v5 }
  0x19   :  { %431 = vmatpush.bf16.msra.mxu2 %v1176_v50 }
  0x1a   :  { %187 = vmatpush.bf16.msra.mxu0 %v1166_v6 }
  0x1d   :  { %432 = vmatpush.bf16.msra.mxu2 %v1175_v52 }
  0x1e   :  { %188 = vmatpush.bf16.msra.mxu0 %v1165_v7 }
  0x21   :  { %189 = vmatmul.bf16.vlgmr.msra.gmra.mxu0 %v1157_v8  ;;  %433 = vmatpush.bf16.msra.mxu2 %v1174_v53 }
  0x25   :  { %434 = vmatpush.bf16.msra.mxu2 %v1173_v54 }
  0x31   :  { %194 = vmatmul.bf16.gmra.mxu0 %v1158_v9 }
  0x41   :  { %199 = vmatmul.bf16.gmra.mxu0 %v1159_v10 }
  0x51   :  { %204 = vmatmul.bf16.gmra.mxu0 %v1160_v11 }
  0x61   :  { %209 = vmatmul.bf16.gmra.mxu0 %v1161_v12 }
  0x71   :  { %214 = vmatmul.bf16.gmra.mxu0 %v1162_v13 }
  0x81   :  { %219 = vmatmul.bf16.gmra.mxu0 %v1163_v14 }
  0x91   :  { %224 = vmatmul.bf16.gmra.mxu0 %v1164_v15 }
  0x9e   :  { %v190_v16 = vpop.f32.mrf.mxu0 }
  0xa6   :  { %v192_v17 = vpop.f32.mrf.mxu0 }
  0xa7   :  { %v230_v39 = vpack.c.bf16 %v192_v17, %v190_v16 }
  0xae   :  { %v195_v18 = vpop.f32.mrf.mxu0 }
  0xb6   :  { %v197_v19 = vpop.f32.mrf.mxu0 }
  0xb7   :  { %v231_v38 = vpack.c.bf16 %v197_v19, %v195_v18 }
  0xbe   :  { %v200_v20 = vpop.f32.mrf.mxu0 }
  0xc6   :  { %v202_v21 = vpop.f32.mrf.mxu0 }
  0xc7   :  { %v232_v37 = vpack.c.bf16 %v202_v21, %v200_v20 }
  0xce   :  { %v205_v22 = vpop.f32.mrf.mxu0 }
  0xd6   :  { %v207_v23 = vpop.f32.mrf.mxu0 }
  0xd7   :  { %v233_v36 = vpack.c.bf16 %v207_v23, %v205_v22 }
  0xde   :  { %v210_v24 = vpop.f32.mrf.mxu0 }
  0xe6   :  { %v212_v25 = vpop.f32.mrf.mxu0 }
  0xe7   :  { %v234_v35 = vpack.c.bf16 %v212_v25, %v210_v24 }
  0xee   :  { %v215_v26 = vpop.f32.mrf.mxu0 }
  0xf6   :  { %v217_v27 = vpop.f32.mrf.mxu0 }
  0xf7   :  { %v235_v34 = vpack.c.bf16 %v217_v27, %v215_v26 }
  0xfe   :  { %v220_v28 = vpop.f32.mrf.mxu0 }
 0x106   :  { %v222_v29 = vpop.f32.mrf.mxu0 }
 0x107   :  { %v236_v33 = vpack.c.bf16 %v222_v29, %v220_v28 }
 0x10e   :  { %v225_v30 = vpop.f32.mrf.mxu0 }
 0x116   :  { %v227_v31 = vpop.f32.mrf.mxu0 }
 0x117   :  { %v237_v32 = vpack.c.bf16 %v227_v31, %v225_v30 }
 0x119   :  { %290 = vmatpush.bf16.msra.mxu1 %v237_v32 }
 0x11d   :  { %291 = vmatpush.bf16.msra.mxu1 %v236_v33 }
 0x121   :  { %292 = vmatpush.bf16.msra.mxu1 %v235_v34 }
 0x125   :  { %293 = vmatpush.bf16.msra.mxu1 %v234_v35 }
 0x129   :  { %294 = vmatpush.bf16.msra.mxu1 %v233_v36 }
 0x12d   :  { %295 = vmatpush.bf16.msra.mxu1 %v232_v37 }
 0x131   :  { %296 = vmatpush.bf16.msra.mxu1 %v231_v38 }
 0x135   :  { %297 = vmatpush.bf16.msra.mxu1 %v230_v39 }
 0x138   :  { %298 = vmatmul.bf16.vlgmr.msra.gmra.mxu1 %v1312_v40 }
 0x148   :  { %303 = vmatmul.bf16.gmra.mxu1 %v1318_v41 }
 0x158   :  { %308 = vmatmul.bf16.gmra.mxu1 %v1324_v42 }
 0x168   :  { %313 = vmatmul.bf16.gmra.mxu1 %v1330_v43 }
 0x178   :  { %318 = vmatmul.bf16.gmra.mxu1 %v1336_v44 }
 0x188   :  { %323 = vmatmul.bf16.gmra.mxu1 %v1345_v46 }
 0x198   :  { %328 = vmatmul.bf16.gmra.mxu1 %v1363_v51 }
 0x1a8   :  { %333 = vmatmul.bf16.gmra.mxu1 %v1378_v55 }
 0x1b5   :  { %v299_v56 = vpop.f32.mrf.mxu1 }
 0x1b6   :  { %v300_v58 = vadd.f32 %v1197_v57, %v299_v56 }
 0x1b8   :  { %v339_v61 = vmax.f32 %v300_v58, 0.0 }
 0x1bd   :  { %v301_v59 = vpop.f32.mrf.mxu1 }
 0x1be   :  { %v302_v60 = vadd.f32 %v1197_v57, %v301_v59 }
 0x1c0   :  { %v340_v62 = vmax.f32 %v302_v60, 0.0 }
 0x1c2   :  { %v355_v63 = vpack.c.bf16 %v340_v62, %v339_v61 }
 0x1c4   :  { %435 = vmatmul.bf16.vlgmr.msra.gmra.mxu2 %v355_v63 }
 0x1c5   :  { %v304_v0 = vpop.f32.mrf.mxu1 }
 0x1c6   :  { %v305_v1 = vadd.f32 %v1197_v57, %v304_v0 }
 0x1c8   :  { %v341_v4 = vmax.f32 %v305_v1, 0.0 }
 0x1cd   :  { %v306_v2 = vpop.f32.mrf.mxu1 }
 0x1ce   :  { %v307_v3 = vadd.f32 %v1197_v57, %v306_v2 }
 0x1d0   :  { %v342_v5 = vmax.f32 %v307_v3, 0.0 }
 0x1d2   :  { %v356_v6 = vpack.c.bf16 %v342_v5, %v341_v4 }
 0x1d4   :  { %440 = vmatmul.bf16.gmra.mxu2 %v356_v6 }
 0x1d5   :  { %v309_v7 = vpop.f32.mrf.mxu1 }
 0x1d6   :  { %v310_v8 = vadd.f32 %v1197_v57, %v309_v7 }
 0x1d8   :  { %v343_v11 = vmax.f32 %v310_v8, 0.0 }
 0x1dd   :  { %v311_v9 = vpop.f32.mrf.mxu1 }
 0x1de   :  { %v312_v10 = vadd.f32 %v1197_v57, %v311_v9 }
 0x1e0   :  { %v344_v12 = vmax.f32 %v312_v10, 0.0 }
 0x1e2   :  { %v357_v13 = vpack.c.bf16 %v344_v12, %v343_v11 }
 0x1e4   :  { %445 = vmatmul.bf16.gmra.mxu2 %v357_v13 }
 0x1e5   :  { %v314_v14 = vpop.f32.mrf.mxu1 }
 0x1e6   :  { %v315_v15 = vadd.f32 %v1197_v57, %v314_v14 }
 0x1e8   :  { %v345_v18 = vmax.f32 %v315_v15, 0.0 }
 0x1ed   :  { %v316_v16 = vpop.f32.mrf.mxu1 }
 0x1ee   :  { %v317_v17 = vadd.f32 %v1197_v57, %v316_v16 }
 0x1f0   :  { %v346_v19 = vmax.f32 %v317_v17, 0.0  ;;  %v1188_v17 = vld [vmem:[%s1567_s6 + $0x38] sm:$0xff] }
 0x1f1   :  { %625 = vmatpush.bf16.msrb.mxu0 %v1188_v17 }
 0x1f2   :  { %v358_v20 = vpack.c.bf16 %v346_v19, %v345_v18  ;;  %v1187_v18 = vld [vmem:[%s1567_s6 + $0x30] sm:$0xff]  ;;  %v1186_v19 = vld [vmem:[%s1567_s6 + $0x28] sm:$0xff] }
 0x1f4   :  { %450 = vmatmul.bf16.gmra.mxu2 %v358_v20  ;;  %v1185_v20 = vld [vmem:[%s1567_s6 + $0x20] sm:$0xff] }
 0x1f5   :  { %v319_v21 = vpop.f32.mrf.mxu1  ;;  %626 = vmatpush.bf16.msrb.mxu0 %v1187_v18 }
 0x1f6   :  { %v320_v22 = vadd.f32 %v1197_v57, %v319_v21  ;;  %v1184_v21 = vld [vmem:[%s1567_s6 + $0x18] sm:$0xff] }
 0x1f8   :  { %v347_v25 = vmax.f32 %v320_v22, 0.0  ;;  %v1183_v22 = vld [vmem:[%s1567_s6 + $0x10] sm:$0xff] }
 0x1f9   :  { %627 = vmatpush.bf16.msrb.mxu0 %v1186_v19 }
 0x1fd   :  { %v321_v23 = vpop.f32.mrf.mxu1  ;;  %628 = vmatpush.bf16.msrb.mxu0 %v1185_v20 }
 0x1fe   :  { %v322_v24 = vadd.f32 %v1197_v57, %v321_v23  ;;  %v1182_v23 = vld [vmem:[%s1567_s6 + $0x8] sm:$0xff] }
 0x200   :  { %v348_v26 = vmax.f32 %v322_v24, 0.0  ;;  %v1181_v24 = vld [vmem:[%s1567_s6] sm:$0xff] }
 0x201   :  { %629 = vmatpush.bf16.msrb.mxu0 %v1184_v21 }
 0x202   :  { %v359_v27 = vpack.c.bf16 %v348_v26, %v347_v25  ;;  %v1198_v25 = vld [vmem:[%s1566_s5] ss:$0 sm:$0xff] }
 0x204   :  { %455 = vmatmul.bf16.gmra.mxu2 %v359_v27 }
 0x205   :  { %v324_v28 = vpop.f32.mrf.mxu1  ;;  %630 = vmatpush.bf16.msrb.mxu0 %v1183_v22 }
 0x206   :  { %v325_v29 = vadd.f32 %v1197_v57, %v324_v28 }
 0x208   :  { %v349_v32 = vmax.f32 %v325_v29, 0.0 }
 0x209   :  { %631 = vmatpush.bf16.msrb.mxu0 %v1182_v23 }
 0x20d   :  { %v326_v30 = vpop.f32.mrf.mxu1  ;;  %632 = vmatpush.bf16.msrb.mxu0 %v1181_v24 }
 0x20e   :  { %v327_v31 = vadd.f32 %v1197_v57, %v326_v30 }
 0x210   :  { %v350_v33 = vmax.f32 %v327_v31, 0.0 }
 0x212   :  { %v360_v34 = vpack.c.bf16 %v350_v33, %v349_v32 }
 0x214   :  { %460 = vmatmul.bf16.gmra.mxu2 %v360_v34 }
 0x215   :  { %v329_v35 = vpop.f32.mrf.mxu1 }
 0x216   :  { %v330_v36 = vadd.f32 %v1197_v57, %v329_v35 }
 0x218   :  { %v351_v39 = vmax.f32 %v330_v36, 0.0 }
 0x21d   :  { %v331_v37 = vpop.f32.mrf.mxu1 }
 0x21e   :  { %v332_v38 = vadd.f32 %v1197_v57, %v331_v37 }
 0x220   :  { %v352_v45 = vmax.f32 %v332_v38, 0.0 }
 0x222   :  { %v361_v47 = vpack.c.bf16 %v352_v45, %v351_v39 }
 0x224   :  { %465 = vmatmul.bf16.gmra.mxu2 %v361_v47 }
 0x225   :  { %v334_v48 = vpop.f32.mrf.mxu1 }
 0x226   :  { %v335_v49 = vadd.f32 %v1197_v57, %v334_v48 }
 0x228   :  { %v353_v53 = vmax.f32 %v335_v49, 0.0 }
 0x22d   :  { %v336_v50 = vpop.f32.mrf.mxu1 }
 0x22e   :  { %v337_v52 = vadd.f32 %v1197_v57, %v336_v50 }
 0x230   :  { %v354_v54 = vmax.f32 %v337_v52, 0.0 }
 0x232   :  { %v362_v56 = vpack.c.bf16 %v354_v54, %v353_v53 }
 0x234   :  { %470 = vmatmul.bf16.gmra.mxu2 %v362_v56 }
 0x247   :  { %v436_v58 = vpop.f32.mrf.mxu2 }
 0x24f   :  { %v438_v59 = vpop.f32.mrf.mxu2 }
 0x250   :  { %v476_v16 = vpack.c.bf16 %v438_v59, %v436_v58 }
 0x257   :  { %v441_v60 = vpop.f32.mrf.mxu2 }
 0x25f   :  { %v443_v61 = vpop.f32.mrf.mxu2 }
 0x260   :  { %v477_v15 = vpack.c.bf16 %v443_v61, %v441_v60 }
 0x267   :  { %v446_v62 = vpop.f32.mrf.mxu2 }
 0x26f   :  { %v448_v63 = vpop.f32.mrf.mxu2 }
 0x270   :  { %v478_v14 = vpack.c.bf16 %v448_v63, %v446_v62 }
 0x277   :  { %v451_v0 = vpop.f32.mrf.mxu2 }
 0x27f   :  { %v453_v1 = vpop.f32.mrf.mxu2 }
 0x280   :  { %v479_v13 = vpack.c.bf16 %v453_v1, %v451_v0 }
 0x287   :  { %v456_v2 = vpop.f32.mrf.mxu2 }
 0x28f   :  { %v458_v3 = vpop.f32.mrf.mxu2 }
 0x290   :  { %v480_v12 = vpack.c.bf16 %v458_v3, %v456_v2 }
 0x297   :  { %v461_v4 = vpop.f32.mrf.mxu2 }
 0x29f   :  { %v463_v5 = vpop.f32.mrf.mxu2 }
 0x2a0   :  { %v481_v11 = vpack.c.bf16 %v463_v5, %v461_v4 }
 0x2a7   :  { %v466_v6 = vpop.f32.mrf.mxu2 }
 0x2af   :  { %v468_v7 = vpop.f32.mrf.mxu2 }
 0x2b0   :  { %v482_v10 = vpack.c.bf16 %v468_v7, %v466_v6 }
 0x2b7   :  { %v471_v8 = vpop.f32.mrf.mxu2 }
 0x2bf   :  { %v473_v57 = vpop.f32.mrf.mxu2 }
 0x2c0   :  { %v483_v9 = vpack.c.bf16 %v473_v57, %v471_v8 }
 0x2c2   :  { %488 = vmatpush.bf16.msra.mxu3 %v483_v9 }
 0x2c6   :  { %489 = vmatpush.bf16.msra.mxu3 %v482_v10 }
 0x2ca   :  { %490 = vmatpush.bf16.msra.mxu3 %v481_v11 }
 0x2ce   :  { %491 = vmatpush.bf16.msra.mxu3 %v480_v12 }
 0x2d2   :  { %492 = vmatpush.bf16.msra.mxu3 %v479_v13 }
 0x2d6   :  { %493 = vmatpush.bf16.msra.mxu3 %v478_v14 }
 0x2da   :  { %494 = vmatpush.bf16.msra.mxu3 %v477_v15 }
 0x2de   :  { %495 = vmatpush.bf16.msra.mxu3 %v476_v16 }
 0x2e1   :  { %496 = vmatmul.bf16.vlgmr.msra.gmra.mxu3 %v1312_v40 }
 0x2f1   :  { %501 = vmatmul.bf16.gmra.mxu3 %v1318_v41 }
 0x301   :  { %506 = vmatmul.bf16.gmra.mxu3 %v1324_v42 }
 0x311   :  { %511 = vmatmul.bf16.gmra.mxu3 %v1330_v43 }
 0x321   :  { %516 = vmatmul.bf16.gmra.mxu3 %v1336_v44 }
 0x331   :  { %521 = vmatmul.bf16.gmra.mxu3 %v1345_v46 }
 0x341   :  { %526 = vmatmul.bf16.gmra.mxu3 %v1363_v51 }
 0x351   :  { %531 = vmatmul.bf16.gmra.mxu3 %v1378_v55 }
 0x364   :  { %v497_v26 = vpop.f32.mrf.mxu3 }
 0x365   :  { %v498_v27 = vadd.f32 %v1198_v25, %v497_v26 }
 0x367   :  { %537 = vst [vmem:[%s1568_s10] sm:$0xff] %v498_v27 }
 0x36c   :  { %v499_v28 = vpop.f32.mrf.mxu3 }
 0x36d   :  { %v500_v29 = vadd.f32 %v1198_v25, %v499_v28 }
 0x36f   :  { %538 = vst [vmem:[%s1568_s10 + $0x8] sm:$0xff] %v500_v29  ;;  %v553_v30 = vpack.c.bf16 %v500_v29, %v498_v27 }
 0x371   :  { %633 = vmatmul.bf16.vlgmr.msrb.gmra.mxu0 %v553_v30 }
 0x374   :  { %v502_v31 = vpop.f32.mrf.mxu3 }
 0x375   :  { %v503_v32 = vadd.f32 %v1198_v25, %v502_v31 }
 0x377   :  { %539 = vst [vmem:[%s1568_s10 + $0x10] sm:$0xff] %v503_v32 }
 0x37c   :  { %v504_v33 = vpop.f32.mrf.mxu3 }
 0x37d   :  { %v505_v34 = vadd.f32 %v1198_v25, %v504_v33 }
 0x37f   :  { %540 = vst [vmem:[%s1568_s10 + $0x18] sm:$0xff] %v505_v34  ;;  %v554_v35 = vpack.c.bf16 %v505_v34, %v503_v32  ;;  %v1196_v34 = vld [vmem:[%s1570_s8 + $0x38] sm:$0xff] }
 0x380   :  { %823 = vmatpush.bf16.msrb.mxu2 %v1196_v34 }
 0x381   :  { %638 = vmatmul.bf16.gmra.mxu0 %v554_v35  ;;  %v1195_v35 = vld [vmem:[%s1570_s8 + $0x30] sm:$0xff] }
 0x384   :  { %v507_v36 = vpop.f32.mrf.mxu3  ;;  %824 = vmatpush.bf16.msrb.mxu2 %v1195_v35 }
 0x385   :  { %v508_v37 = vadd.f32 %v1198_v25, %v507_v36  ;;  %v1194_v36 = vld [vmem:[%s1570_s8 + $0x28] sm:$0xff] }
 0x387   :  { %541 = vst [vmem:[%s1568_s10 + $0x20] sm:$0xff] %v508_v37 }
 0x388   :  { %825 = vmatpush.bf16.msrb.mxu2 %v1194_v36 }
 0x38c   :  { %v509_v38 = vpop.f32.mrf.mxu3 }
 0x38d   :  { %v510_v39 = vadd.f32 %v1198_v25, %v509_v38  ;;  %v1192_v38 = vld [vmem:[%s1570_s8 + $0x18] sm:$0xff] }
 0x38f   :  { %542 = vst [vmem:[%s1568_s10 + $0x28] sm:$0xff] %v510_v39  ;;  %v555_v45 = vpack.c.bf16 %v510_v39, %v508_v37  ;;  %v1193_v37 = vld [vmem:[%s1570_s8 + $0x20] sm:$0xff]  ;;  %v1191_v39 = vld [vmem:[%s1570_s8 + $0x10] sm:$0xff] }
 0x390   :  { %826 = vmatpush.bf16.msrb.mxu2 %v1193_v37 }
 0x391   :  { %643 = vmatmul.bf16.gmra.mxu0 %v555_v45  ;;  %v1190_v45 = vld [vmem:[%s1570_s8 + $0x8] sm:$0xff] }
 0x394   :  { %v512_v47 = vpop.f32.mrf.mxu3  ;;  %827 = vmatpush.bf16.msrb.mxu2 %v1192_v38 }
 0x395   :  { %v513_v48 = vadd.f32 %v1198_v25, %v512_v47  ;;  %v1189_v47 = vld [vmem:[%s1570_s8] sm:$0xff] }
 0x397   :  { %543 = vst [vmem:[%s1568_s10 + $0x30] sm:$0xff] %v513_v48 }
 0x398   :  { %828 = vmatpush.bf16.msrb.mxu2 %v1191_v39 }
 0x39c   :  { %v514_v49 = vpop.f32.mrf.mxu3  ;;  %829 = vmatpush.bf16.msrb.mxu2 %v1190_v45 }
 0x39d   :  { %v515_v50 = vadd.f32 %v1198_v25, %v514_v49  ;;  %v1199_v49 = vld [vmem:[%s1569_s7] ss:$0 sm:$0xff] }
 0x39f   :  { %544 = vst [vmem:[%s1568_s10 + $0x38] sm:$0xff] %v515_v50  ;;  %v556_v52 = vpack.c.bf16 %v515_v50, %v513_v48 }
 0x3a0   :  { %830 = vmatpush.bf16.msrb.mxu2 %v1189_v47 }
 0x3a1   :  { %648 = vmatmul.bf16.gmra.mxu0 %v556_v52 }
 0x3a4   :  { %v517_v53 = vpop.f32.mrf.mxu3 }
 0x3a5   :  { %v518_v54 = vadd.f32 %v1198_v25, %v517_v53 }
 0x3a7   :  { %545 = vst [vmem:[%s1568_s10 + $0x40] sm:$0xff] %v518_v54 }
 0x3ac   :  { %v519_v56 = vpop.f32.mrf.mxu3 }
 0x3ad   :  { %v520_v58 = vadd.f32 %v1198_v25, %v519_v56 }
 0x3af   :  { %546 = vst [vmem:[%s1568_s10 + $0x48] sm:$0xff] %v520_v58  ;;  %v557_v59 = vpack.c.bf16 %v520_v58, %v518_v54 }
 0x3b1   :  { %653 = vmatmul.bf16.gmra.mxu0 %v557_v59 }
 0x3b4   :  { %v522_v60 = vpop.f32.mrf.mxu3 }
 0x3b5   :  { %v523_v61 = vadd.f32 %v1198_v25, %v522_v60 }
 0x3b7   :  { %547 = vst [vmem:[%s1568_s10 + $0x50] sm:$0xff] %v523_v61 }
 0x3bc   :  { %v524_v62 = vpop.f32.mrf.mxu3 }
 0x3bd   :  { %v525_v63 = vadd.f32 %v1198_v25, %v524_v62 }
 0x3bf   :  { %548 = vst [vmem:[%s1568_s10 + $0x58] sm:$0xff] %v525_v63  ;;  %v558_v0 = vpack.c.bf16 %v525_v63, %v523_v61 }
 0x3c1   :  { %658 = vmatmul.bf16.gmra.mxu0 %v558_v0 }
 0x3c4   :  { %v527_v1 = vpop.f32.mrf.mxu3 }
 0x3c5   :  { %v528_v2 = vadd.f32 %v1198_v25, %v527_v1 }
 0x3c7   :  { %549 = vst [vmem:[%s1568_s10 + $0x60] sm:$0xff] %v528_v2 }
 0x3cc   :  { %v529_v3 = vpop.f32.mrf.mxu3 }
 0x3cd   :  { %v530_v4 = vadd.f32 %v1198_v25, %v529_v3 }
 0x3cf   :  { %550 = vst [vmem:[%s1568_s10 + $0x68] sm:$0xff] %v530_v4  ;;  %v559_v5 = vpack.c.bf16 %v530_v4, %v528_v2 }
 0x3d1   :  { %663 = vmatmul.bf16.gmra.mxu0 %v559_v5 }
 0x3d4   :  { %v532_v6 = vpop.f32.mrf.mxu3 }
 0x3d5   :  { %v533_v7 = vadd.f32 %v1198_v25, %v532_v6 }
 0x3d7   :  { %551 = vst [vmem:[%s1568_s10 + $0x70] sm:$0xff] %v533_v7 }
 0x3dc   :  { %v534_v8 = vpop.f32.mrf.mxu3 }
 0x3dd   :  { %v535_v57 = vadd.f32 %v1198_v25, %v534_v8 }
 0x3df   :  { %552 = vst [vmem:[%s1568_s10 + $0x78] sm:$0xff] %v535_v57  ;;  %v560_v9 = vpack.c.bf16 %v535_v57, %v533_v7 }
 0x3e1   :  { %668 = vmatmul.bf16.gmra.mxu0 %v560_v9 }
 0x3ee   :  { %v634_v10 = vpop.f32.mrf.mxu0 }
 0x3f6   :  { %v636_v11 = vpop.f32.mrf.mxu0 }
 0x3f7   :  { %v674_v12 = vpack.c.bf16 %v636_v11, %v634_v10 }
 0x3fe   :  { %v639_v13 = vpop.f32.mrf.mxu0 }
 0x406   :  { %v641_v14 = vpop.f32.mrf.mxu0 }
 0x407   :  { %v675_v15 = vpack.c.bf16 %v641_v14, %v639_v13 }
 0x40e   :  { %v644_v16 = vpop.f32.mrf.mxu0 }
 0x416   :  { %v646_v17 = vpop.f32.mrf.mxu0 }
 0x417   :  { %v676_v18 = vpack.c.bf16 %v646_v17, %v644_v16 }
 0x41e   :  { %v649_v19 = vpop.f32.mrf.mxu0 }
 0x426   :  { %v651_v20 = vpop.f32.mrf.mxu0 }
 0x427   :  { %v677_v21 = vpack.c.bf16 %v651_v20, %v649_v19 }
 0x42e   :  { %v654_v22 = vpop.f32.mrf.mxu0 }
 0x436   :  { %v656_v23 = vpop.f32.mrf.mxu0 }
 0x437   :  { %v678_v33 = vpack.c.bf16 %v656_v23, %v654_v22 }
 0x43e   :  { %v659_v24 = vpop.f32.mrf.mxu0 }
 0x446   :  { %v661_v25 = vpop.f32.mrf.mxu0 }
 0x447   :  { %v679_v32 = vpack.c.bf16 %v661_v25, %v659_v24 }
 0x44e   :  { %v664_v26 = vpop.f32.mrf.mxu0 }
 0x456   :  { %v666_v27 = vpop.f32.mrf.mxu0 }
 0x457   :  { %v680_v31 = vpack.c.bf16 %v666_v27, %v664_v26 }
 0x45e   :  { %v669_v28 = vpop.f32.mrf.mxu0 }
 0x466   :  { %v671_v29 = vpop.f32.mrf.mxu0 }
 0x467   :  { %v681_v30 = vpack.c.bf16 %v671_v29, %v669_v28 }
 0x469   :  { %686 = vmatpush.bf16.msrb.mxu1 %v681_v30 }
 0x46d   :  { %687 = vmatpush.bf16.msrb.mxu1 %v680_v31 }
 0x471   :  { %688 = vmatpush.bf16.msrb.mxu1 %v679_v32 }
 0x475   :  { %689 = vmatpush.bf16.msrb.mxu1 %v678_v33 }
 0x479   :  { %690 = vmatpush.bf16.msrb.mxu1 %v677_v21 }
 0x47d   :  { %691 = vmatpush.bf16.msrb.mxu1 %v676_v18 }
 0x481   :  { %692 = vmatpush.bf16.msrb.mxu1 %v675_v15 }
 0x485   :  { %693 = vmatpush.bf16.msrb.mxu1 %v674_v12 }
 0x488   :  { %694 = vmatmul.bf16.vlgmr.msrb.gmra.mxu1 %v1312_v40 }
 0x498   :  { %699 = vmatmul.bf16.gmra.mxu1 %v1318_v41 }
 0x4a8   :  { %704 = vmatmul.bf16.gmra.mxu1 %v1324_v42 }
 0x4b8   :  { %709 = vmatmul.bf16.gmra.mxu1 %v1330_v43 }
 0x4c8   :  { %714 = vmatmul.bf16.gmra.mxu1 %v1336_v44 }
 0x4d8   :  { %719 = vmatmul.bf16.gmra.mxu1 %v1345_v46 }
 0x4e8   :  { %724 = vmatmul.bf16.gmra.mxu1 %v1363_v51 }
 0x4f8   :  { %729 = vmatmul.bf16.gmra.mxu1 %v1378_v55 }
 0x505   :  { %v695_v48 = vpop.f32.mrf.mxu1 }
 0x506   :  { %v696_v50 = vadd.f32 %v1199_v49, %v695_v48 }
 0x508   :  { %v735_v54 = vmax.f32 %v696_v50, 0.0 }
 0x50d   :  { %v697_v52 = vpop.f32.mrf.mxu1 }
 0x50e   :  { %v698_v53 = vadd.f32 %v1199_v49, %v697_v52 }
 0x510   :  { %v736_v56 = vmax.f32 %v698_v53, 0.0 }
 0x512   :  { %v751_v58 = vpack.c.bf16 %v736_v56, %v735_v54 }
 0x514   :  { %831 = vmatmul.bf16.vlgmr.msrb.gmra.mxu2 %v751_v58 }
 0x515   :  { %v700_v59 = vpop.f32.mrf.mxu1 }
 0x516   :  { %v701_v60 = vadd.f32 %v1199_v49, %v700_v59 }
 0x518   :  { %v737_v63 = vmax.f32 %v701_v60, 0.0 }
 0x51d   :  { %v702_v61 = vpop.f32.mrf.mxu1 }
 0x51e   :  { %v703_v62 = vadd.f32 %v1199_v49, %v702_v61 }
 0x520   :  { %v738_v0 = vmax.f32 %v703_v62, 0.0 }
 0x522   :  { %v752_v1 = vpack.c.bf16 %v738_v0, %v737_v63 }
 0x524   :  { %836 = vmatmul.bf16.gmra.mxu2 %v752_v1 }
 0x525   :  { %v705_v2 = vpop.f32.mrf.mxu1 }
 0x526   :  { %v706_v3 = vadd.f32 %v1199_v49, %v705_v2 }
 0x528   :  { %v739_v6 = vmax.f32 %v706_v3, 0.0 }
 0x52d   :  { %v707_v4 = vpop.f32.mrf.mxu1 }
 0x52e   :  { %v708_v5 = vadd.f32 %v1199_v49, %v707_v4 }
 0x530   :  { %v740_v7 = vmax.f32 %v708_v5, 0.0 }
 0x532   :  { %v753_v8 = vpack.c.bf16 %v740_v7, %v739_v6 }
 0x534   :  { %841 = vmatmul.bf16.gmra.mxu2 %v753_v8 }
 0x535   :  { %v710_v57 = vpop.f32.mrf.mxu1 }
 0x536   :  { %v711_v9 = vadd.f32 %v1199_v49, %v710_v57 }
 0x538   :  { %v741_v12 = vmax.f32 %v711_v9, 0.0 }
 0x53d   :  { %v712_v10 = vpop.f32.mrf.mxu1 }
 0x53e   :  { %v713_v11 = vadd.f32 %v1199_v49, %v712_v10 }
 0x540   :  { %v742_v13 = vmax.f32 %v713_v11, 0.0  ;;  %v1200_v11 = vld [vmem:[%s1571_s9] ss:$0 sm:$0xff] }
 0x542   :  { %v754_v14 = vpack.c.bf16 %v742_v13, %v741_v12 }
 0x544   :  { %846 = vmatmul.bf16.gmra.mxu2 %v754_v14 }
 0x545   :  { %v715_v15 = vpop.f32.mrf.mxu1 }
 0x546   :  { %v716_v16 = vadd.f32 %v1199_v49, %v715_v15 }
 0x548   :  { %v743_v19 = vmax.f32 %v716_v16, 0.0 }
 0x54d   :  { %v717_v17 = vpop.f32.mrf.mxu1 }
 0x54e   :  { %v718_v18 = vadd.f32 %v1199_v49, %v717_v17 }
 0x550   :  { %v744_v20 = vmax.f32 %v718_v18, 0.0 }
 0x552   :  { %v755_v21 = vpack.c.bf16 %v744_v20, %v743_v19 }
 0x554   :  { %851 = vmatmul.bf16.gmra.mxu2 %v755_v21 }
 0x555   :  { %v720_v22 = vpop.f32.mrf.mxu1 }
 0x556   :  { %v721_v23 = vadd.f32 %v1199_v49, %v720_v22 }
 0x558   :  { %v745_v26 = vmax.f32 %v721_v23, 0.0 }
 0x55d   :  { %v722_v24 = vpop.f32.mrf.mxu1 }
 0x55e   :  { %v723_v25 = vadd.f32 %v1199_v49, %v722_v24 }
 0x560   :  { %v746_v27 = vmax.f32 %v723_v25, 0.0 }
 0x562   :  { %v756_v28 = vpack.c.bf16 %v746_v27, %v745_v26 }
 0x564   :  { %856 = vmatmul.bf16.gmra.mxu2 %v756_v28 }
 0x565   :  { %v725_v29 = vpop.f32.mrf.mxu1 }
 0x566   :  { %v726_v30 = vadd.f32 %v1199_v49, %v725_v29 }
 0x568   :  { %v747_v33 = vmax.f32 %v726_v30, 0.0 }
 0x56d   :  { %v727_v31 = vpop.f32.mrf.mxu1 }
 0x56e   :  { %v728_v32 = vadd.f32 %v1199_v49, %v727_v31 }
 0x570   :  { %v748_v34 = vmax.f32 %v728_v32, 0.0 }
 0x572   :  { %v757_v35 = vpack.c.bf16 %v748_v34, %v747_v33 }
 0x574   :  { %861 = vmatmul.bf16.gmra.mxu2 %v757_v35 }
 0x575   :  { %v730_v36 = vpop.f32.mrf.mxu1 }
 0x576   :  { %v731_v37 = vadd.f32 %v1199_v49, %v730_v36 }
 0x578   :  { %v749_v45 = vmax.f32 %v731_v37, 0.0 }
 0x57d   :  { %v732_v38 = vpop.f32.mrf.mxu1 }
 0x57e   :  { %v733_v39 = vadd.f32 %v1199_v49, %v732_v38 }
 0x580   :  { %v750_v47 = vmax.f32 %v733_v39, 0.0 }
 0x582   :  { %v758_v48 = vpack.c.bf16 %v750_v47, %v749_v45 }
 0x584   :  { %866 = vmatmul.bf16.gmra.mxu2 %v758_v48 }
 0x597   :  { %v832_v50 = vpop.f32.mrf.mxu2 }
 0x59f   :  { %v834_v52 = vpop.f32.mrf.mxu2 }
 0x5a0   :  { %v872_v53 = vpack.c.bf16 %v834_v52, %v832_v50 }
 0x5a7   :  { %v837_v54 = vpop.f32.mrf.mxu2 }
 0x5af   :  { %v839_v56 = vpop.f32.mrf.mxu2 }
 0x5b0   :  { %v873_v58 = vpack.c.bf16 %v839_v56, %v837_v54 }
 0x5b7   :  { %v842_v59 = vpop.f32.mrf.mxu2 }
 0x5bf   :  { %v844_v60 = vpop.f32.mrf.mxu2 }
 0x5c0   :  { %v874_v61 = vpack.c.bf16 %v844_v60, %v842_v59 }
 0x5c7   :  { %v847_v62 = vpop.f32.mrf.mxu2 }
 0x5cf   :  { %v849_v63 = vpop.f32.mrf.mxu2 }
 0x5d0   :  { %v875_v0 = vpack.c.bf16 %v849_v63, %v847_v62 }
 0x5d7   :  { %v852_v1 = vpop.f32.mrf.mxu2 }
 0x5df   :  { %v854_v2 = vpop.f32.mrf.mxu2 }
 0x5e0   :  { %v876_v10 = vpack.c.bf16 %v854_v2, %v852_v1 }
 0x5e7   :  { %v857_v3 = vpop.f32.mrf.mxu2 }
 0x5ef   :  { %v859_v49 = vpop.f32.mrf.mxu2 }
 0x5f0   :  { %v877_v9 = vpack.c.bf16 %v859_v49, %v857_v3 }
 0x5f7   :  { %v862_v4 = vpop.f32.mrf.mxu2 }
 0x5ff   :  { %v864_v5 = vpop.f32.mrf.mxu2 }
 0x600   :  { %v878_v57 = vpack.c.bf16 %v864_v5, %v862_v4 }
 0x607   :  { %v867_v6 = vpop.f32.mrf.mxu2 }
 0x60f   :  { %v869_v7 = vpop.f32.mrf.mxu2 }
 0x610   :  { %v879_v8 = vpack.c.bf16 %v869_v7, %v867_v6 }
 0x612   :  { %884 = vmatpush.bf16.msrb.mxu3 %v879_v8 }
 0x616   :  { %885 = vmatpush.bf16.msrb.mxu3 %v878_v57 }
 0x61a   :  { %886 = vmatpush.bf16.msrb.mxu3 %v877_v9 }
 0x61e   :  { %887 = vmatpush.bf16.msrb.mxu3 %v876_v10 }
 0x622   :  { %888 = vmatpush.bf16.msrb.mxu3 %v875_v0 }
 0x626   :  { %889 = vmatpush.bf16.msrb.mxu3 %v874_v61 }
 0x62a   :  { %890 = vmatpush.bf16.msrb.mxu3 %v873_v58 }
 0x62e   :  { %891 = vmatpush.bf16.msrb.mxu3 %v872_v53 }
 0x631   :  { %892 = vmatmul.bf16.vlgmr.msrb.gmra.mxu3 %v1312_v40 }
 0x641   :  { %897 = vmatmul.bf16.gmra.mxu3 %v1318_v41 }
 0x651   :  { %902 = vmatmul.bf16.gmra.mxu3 %v1324_v42 }
 0x661   :  { %907 = vmatmul.bf16.gmra.mxu3 %v1330_v43 }
 0x671   :  { %912 = vmatmul.bf16.gmra.mxu3 %v1336_v44 }
 0x681   :  { %917 = vmatmul.bf16.gmra.mxu3 %v1345_v46 }
 0x691   :  { %922 = vmatmul.bf16.gmra.mxu3 %v1363_v51 }
 0x6a1   :  { %927 = vmatmul.bf16.gmra.mxu3 %v1378_v55 }
 0x6b4   :  { %v893_v12 = vpop.f32.mrf.mxu3 }
 0x6b5   :  { %v894_v40 = vadd.f32 %v1200_v11, %v893_v12 }
 0x6b7   :  { %933 = vst [vmem:[%s1572_s11] sm:$0xff] %v894_v40 }
 0x6bc   :  { %v895_v41 = vpop.f32.mrf.mxu3 }
 0x6bd   :  { %v896_v42 = vadd.f32 %v1200_v11, %v895_v41 }
 0x6bf   :  { %934 = vst [vmem:[%s1572_s11 + $0x8] sm:$0xff] %v896_v42 }
 0x6c4   :  { %v898_v43 = vpop.f32.mrf.mxu3 }
 0x6c5   :  { %v899_v44 = vadd.f32 %v1200_v11, %v898_v43 }
 0x6c7   :  { %935 = vst [vmem:[%s1572_s11 + $0x10] sm:$0xff] %v899_v44 }
 0x6cc   :  { %v900_v46 = vpop.f32.mrf.mxu3 }
 0x6cd   :  { %v901_v51 = vadd.f32 %v1200_v11, %v900_v46 }
 0x6cf   :  { %936 = vst [vmem:[%s1572_s11 + $0x18] sm:$0xff] %v901_v51 }
 0x6d4   :  { %v903_v55 = vpop.f32.mrf.mxu3 }
 0x6d5   :  { %v904_v13 = vadd.f32 %v1200_v11, %v903_v55 }
 0x6d7   :  { %937 = vst [vmem:[%s1572_s11 + $0x20] sm:$0xff] %v904_v13 }
 0x6dc   :  { %v905_v14 = vpop.f32.mrf.mxu3 }
 0x6dd   :  { %v906_v15 = vadd.f32 %v1200_v11, %v905_v14 }
 0x6df   :  { %938 = vst [vmem:[%s1572_s11 + $0x28] sm:$0xff] %v906_v15 }
 0x6e4   :  { %v908_v16 = vpop.f32.mrf.mxu3 }
 0x6e5   :  { %v909_v17 = vadd.f32 %v1200_v11, %v908_v16 }
 0x6e7   :  { %939 = vst [vmem:[%s1572_s11 + $0x30] sm:$0xff] %v909_v17 }
 0x6ec   :  { %v910_v18 = vpop.f32.mrf.mxu3 }
 0x6ed   :  { %v911_v19 = vadd.f32 %v1200_v11, %v910_v18 }
 0x6ef   :  { %940 = vst [vmem:[%s1572_s11 + $0x38] sm:$0xff] %v911_v19 }
 0x6f4   :  { %v913_v20 = vpop.f32.mrf.mxu3 }
 0x6f5   :  { %v914_v21 = vadd.f32 %v1200_v11, %v913_v20 }
 0x6f7   :  { %941 = vst [vmem:[%s1572_s11 + $0x40] sm:$0xff] %v914_v21 }
 0x6fc   :  { %v915_v22 = vpop.f32.mrf.mxu3 }
 0x6fd   :  { %v916_v23 = vadd.f32 %v1200_v11, %v915_v22 }
 0x6ff   :  { %942 = vst [vmem:[%s1572_s11 + $0x48] sm:$0xff] %v916_v23 }
 0x704   :  { %v918_v24 = vpop.f32.mrf.mxu3 }
 0x705   :  { %v919_v25 = vadd.f32 %v1200_v11, %v918_v24 }
 0x707   :  { %943 = vst [vmem:[%s1572_s11 + $0x50] sm:$0xff] %v919_v25 }
 0x70c   :  { %v920_v26 = vpop.f32.mrf.mxu3 }
 0x70d   :  { %v921_v27 = vadd.f32 %v1200_v11, %v920_v26 }
 0x70f   :  { %944 = vst [vmem:[%s1572_s11 + $0x58] sm:$0xff] %v921_v27 }
 0x714   :  { %v923_v28 = vpop.f32.mrf.mxu3 }
 0x715   :  { %v924_v29 = vadd.f32 %v1200_v11, %v923_v28 }
 0x717   :  { %945 = vst [vmem:[%s1572_s11 + $0x60] sm:$0xff] %v924_v29 }
 0x71c   :  { %v925_v30 = vpop.f32.mrf.mxu3 }
 0x71d   :  { %v926_v31 = vadd.f32 %v1200_v11, %v925_v30 }
 0x71f   :  { %946 = vst [vmem:[%s1572_s11 + $0x68] sm:$0xff] %v926_v31 }
 0x724   :  { %v928_v32 = vpop.f32.mrf.mxu3 }
 0x725   :  { %v929_v33 = vadd.f32 %v1200_v11, %v928_v32 }
 0x727   :  { %947 = vst [vmem:[%s1572_s11 + $0x70] sm:$0xff] %v929_v33 }
 0x72c   :  { %v930_v34 = vpop.f32.mrf.mxu3 }
 0x72d   :  { %v931_v35 = vadd.f32 %v1200_v11, %v930_v34 }
 0x72f   :  { %948 = vst [vmem:[%s1572_s11 + $0x78] sm:$0xff] %v931_v35 }

</bundles_post_ra>
